<compile_context>
chip_gen: v6e
topology: v6e:2x2x1
jax: 0.10.0
libtpu: 0.0.40
codegen_flags: <defaults>
</compile_context>

<pallas_src>
import functools

import jax
import jax.numpy as jnp
from jax.experimental import pallas as pl
from jax.experimental.pallas import tpu as pltpu

IN_DIM = 2048
HID_DIM = 256
OUT_DIM = 2
NEG_SLOPE = 0.2          # F.leaky_relu(x, 0.2) in the reference module


def fdisc_kernel(x_ref, w1_ref, b1_ref, w2_ref, b2_ref, o_ref, acc_ref):
    """Grid: (reduction over IN_DIM [arbitrary],).  Fully fused forward."""
    k = pl.program_id(0)

    @pl.when(k == 0)
    def _():
        acc_ref[...] = jnp.zeros_like(acc_ref)

    # fc1 partial product: (B, tk) @ (tk, 256), bf16 operands, f32 accum.
    acc_ref[...] += jnp.dot(x_ref[...].astype(jnp.bfloat16), w1_ref[...],
                            preferred_element_type=jnp.float32)

    @pl.when(k == pl.num_programs(0) - 1)
    def _():
        h = acc_ref[...] + b1_ref[...]                 # (B, 256) + (1, 256)
        h = jnp.where(h >= 0, h, NEG_SLOPE * h)        # leaky_relu(., 0.2)
        # fc2 (256 -> 2) as VPU multiply + lane reduction: a (B,256)x(256,2)
        # MXU matmul would waste the array and pay drain latency in the tail.
        p0 = jnp.sum(h * w2_ref[0:1, :], axis=-1, keepdims=True)   # (B, 1)
        p1 = jnp.sum(h * w2_ref[1:2, :], axis=-1, keepdims=True)   # (B, 1)
        logits = jnp.concatenate([p0, p1], axis=-1) + b2_ref[...]  # (B, 2)
        o_ref[...] = jnp.where(logits >= 0,
                               logits, NEG_SLOPE * logits).astype(o_ref.dtype)


def prepare_params(w1, b1, w2, b2):
    """One-time parameter prep — NOT in the per-call jitted path.

    PyTorch Linear stores weights as (out, in); fc1 is pre-transposed to
    (in, out) and cast to bf16 once so the kernel streams half the bytes.
    fc2 stays in its native (2, 256) f32 layout (tiny; reduced along lanes).
    """
    w1_t = jnp.asarray(w1).T.astype(jnp.bfloat16)             # (2048, 256) bf16
    b1_r = jnp.asarray(b1, jnp.float32).reshape(1, HID_DIM)   # (1, 256)
    w2_f = jnp.asarray(w2, jnp.float32)                       # (2, 256)
    b2_r = jnp.asarray(b2, jnp.float32).reshape(1, OUT_DIM)   # (1, 2)
    return w1_t, b1_r, w2_f, b2_r


@functools.partial(jax.jit, static_argnames=("tk",))
def fdisc_forward(x, w1_t, b1, w2, b2, *, tk=2048):
    """x: (B, 2048) f32; params as returned by prepare_params."""
    B = x.shape[0]
    assert IN_DIM % tk == 0
    n_k = IN_DIM // tk

    cost = pl.CostEstimate(
        flops=2 * B * IN_DIM * HID_DIM + 2 * B * HID_DIM * OUT_DIM,
        transcendentals=0,
        bytes_accessed=(IN_DIM * HID_DIM * 2        # bf16 fc1 weight
                        + B * IN_DIM * 4            # x (f32)
                        + B * OUT_DIM * 4           # output
                        + HID_DIM * 4 + OUT_DIM * (HID_DIM + 1) * 4),
    )

    return pl.pallas_call(
        fdisc_kernel,
        out_shape=jax.ShapeDtypeStruct((B, OUT_DIM), jnp.float32),
        grid_spec=pltpu.PrefetchScalarGridSpec(
            num_scalar_prefetch=0,
            grid=(n_k,),
            in_specs=[
                pl.BlockSpec((B, tk), lambda k: (0, k)),               # x slab
                pl.BlockSpec((tk, HID_DIM), lambda k: (k, 0)),         # W1 (bf16)
                pl.BlockSpec((1, HID_DIM), lambda k: (0, 0)),          # b1
                pl.BlockSpec((OUT_DIM, HID_DIM), lambda k: (0, 0)),    # W2
                pl.BlockSpec((1, OUT_DIM), lambda k: (0, 0)),          # b2
            ],
            out_specs=pl.BlockSpec((B, OUT_DIM), lambda k: (0, 0)),
            scratch_shapes=[pltpu.VMEM((B, HID_DIM), jnp.float32)],
        ),
        compiler_params=pltpu.CompilerParams(
            dimension_semantics=("arbitrary",),
            vmem_limit_bytes=32 << 20,
        ),
        cost_estimate=cost,
    )(x, w1_t, b1, w2, b2)


def reference_forward(x, w1, b1, w2, b2):
    h = x @ w1.T + b1
    h = jnp.where(h >= 0, h, NEG_SLOPE * h)
    o = h @ w2.T + b2
    return jnp.where(o >= 0, o, NEG_SLOPE * o)


if __name__ == "__main__":
    key = jax.random.PRNGKey(0)
    kx, k1, k2, k3, k4 = jax.random.split(key, 5)

    B = 8  # small batch; feature dims fixed by the module (2048 -> 256 -> 2)
    x = jax.random.normal(kx, (B, IN_DIM), dtype=jnp.float32)

    # Deterministic synthetic parameters in PyTorch Linear layout (out, in).
    s1 = 1.0 / jnp.sqrt(jnp.float32(IN_DIM))
    s2 = 1.0 / jnp.sqrt(jnp.float32(HID_DIM))
    w1 = jax.random.uniform(k1, (HID_DIM, IN_DIM), jnp.float32, -s1, s1)
    b1 = jax.random.uniform(k2, (HID_DIM,), jnp.float32, -s1, s1)
    w2 = jax.random.uniform(k3, (OUT_DIM, HID_DIM), jnp.float32, -s2, s2)
    b2 = jax.random.uniform(k4, (OUT_DIM,), jnp.float32, -s2, s2)

    params = prepare_params(w1, b1, w2, b2)   # one-time prep, outside forward
    out = jax.block_until_ready(fdisc_forward(x, *params))
    assert out.shape == (B, OUT_DIM)

    # Matched-precision reference (same bf16 rounding of x and fc1 weight).
    x_m = x.astype(jnp.bfloat16).astype(jnp.float32)
    w1_m = w1.astype(jnp.bfloat16).astype(jnp.float32)
    ref_match = reference_forward(x_m, w1_m, b1, w2, b2)
    assert jnp.allclose(out, ref_match, atol=1e-4, rtol=1e-4), (out, ref_match)

    # Loose sanity check against the pure-f32 reference (bf16 weight stream).
    ref_f32 = reference_forward(x, w1, b1, w2, b2)
    assert jnp.allclose(out, ref_f32, atol=3e-2, rtol=3e-2), (out, ref_f32)

    print("KERNEL_OK")
</pallas_src>

<mosaic_0001>
module attributes {stable_mosaic.version = 11 : i64} {
  func.func @fdisc_kernel(%arg0: i32, %arg1: memref<8x2048xf32, #tpu.memory_space<vmem>>, %arg2: memref<2048x256xbf16, #tpu.memory_space<vmem>>, %arg3: memref<1x256xf32, #tpu.memory_space<vmem>>, %arg4: memref<2x256xf32, #tpu.memory_space<vmem>>, %arg5: memref<1x2xf32, #tpu.memory_space<vmem>>, %arg6: memref<8x2xf32, #tpu.memory_space<vmem>>, %arg7: memref<8x256xf32, #tpu.memory_space<vmem>>) attributes {dimension_semantics = [#tpu.dimension_semantics<arbitrary>], iteration_bounds = array<i64: 1>, scalar_prefetch = 0 : i64, scratch_operands = 1 : i64, tpu.core_type = #tpu.core_type<tc>, window_params = [{transform_indices = @transform_0, window_bounds = array<i64: 8, 2048>}, {transform_indices = @transform_1, window_bounds = array<i64: 2048, 256>}, {pipeline_mode = #tpu.pipeline_mode<synchronous>, transform_indices = @transform_2, window_bounds = array<i64: 1, 256>}, {pipeline_mode = #tpu.pipeline_mode<synchronous>, transform_indices = @transform_3, window_bounds = array<i64: 2, 256>}, {pipeline_mode = #tpu.pipeline_mode<synchronous>, transform_indices = @transform_4, window_bounds = array<i64: 1, 2>}, {pipeline_mode = #tpu.pipeline_mode<synchronous>, transform_indices = @transform_5, window_bounds = array<i64: 8, 2>}]} {
    %c0_i32 = arith.constant 0 : i32
    %0 = arith.cmpi eq, %arg0, %c0_i32 : i32
    %1 = arith.extui %0 : i1 to i32
    %c0_i32_0 = arith.constant 0 : i32
    %2 = arith.cmpi ne, %1, %c0_i32_0 : i32
    scf.if %2 {
      %cst_10 = arith.constant 0.000000e+00 : f32
      %13 = vector.broadcast %cst_10 : f32 to vector<8x256xf32>
      %c0_11 = arith.constant 0 : index
      %c0_12 = arith.constant 0 : index
      %14 = vector.load %arg7[%c0_11, %c0_12] : memref<8x256xf32, #tpu.memory_space<vmem>>, vector<8x256xf32>
      tpu.vector_store %arg7[%c0_11, %c0_12], %13 {strides = array<i32>} : memref<8x256xf32, #tpu.memory_space<vmem>>, vector<8x256xf32>,
    } else {
    }
    %c0 = arith.constant 0 : index
    %c0_1 = arith.constant 0 : index
    %3 = vector.load %arg7[%c0, %c0_1] : memref<8x256xf32, #tpu.memory_space<vmem>>, vector<8x256xf32>
    %c0_2 = arith.constant 0 : index
    %c0_3 = arith.constant 0 : index
    %4 = vector.load %arg1[%c0_2, %c0_3] : memref<8x2048xf32, #tpu.memory_space<vmem>>, vector<8x2048xf32>
    %5 = arith.truncf %4 : vector<8x2048xf32> to vector<8x2048xbf16>
    %c0_4 = arith.constant 0 : index
    %c0_5 = arith.constant 0 : index
    %6 = vector.load %arg2[%c0_4, %c0_5] : memref<2048x256xbf16, #tpu.memory_space<vmem>>, vector<2048x256xbf16>
    %cst = arith.constant dense<0.000000e+00> : vector<8x256xf32>
    %7 = tpu.matmul %5, %6, %cst {dimension_numbers = #tpu.dot_dimension_numbers<[1], [0], [0], [1], [0, 0, 1, 1], [], []>} : vector<8x2048xbf16>, vector<2048x256xbf16>, vector<8x256xf32> -> vector<8x256xf32>
    %8 = arith.addf %3, %7 : vector<8x256xf32>
    %c0_6 = arith.constant 0 : index
    %c0_7 = arith.constant 0 : index
    %9 = vector.load %arg7[%c0_6, %c0_7] : memref<8x256xf32, #tpu.memory_space<vmem>>, vector<8x256xf32>
    tpu.vector_store %arg7[%c0_6, %c0_7], %8 {strides = array<i32>} : memref<8x256xf32, #tpu.memory_space<vmem>>, vector<8x256xf32>,
    %c0_i32_8 = arith.constant 0 : i32
    %10 = arith.cmpi eq, %arg0, %c0_i32_8 : i32
    %11 = arith.extui %10 : i1 to i32
    %c0_i32_9 = arith.constant 0 : i32
    %12 = arith.cmpi ne, %11, %c0_i32_9 : i32
    scf.if %12 {
      %c0_10 = arith.constant 0 : index
      %c0_11 = arith.constant 0 : index
      %13 = vector.load %arg7[%c0_10, %c0_11] : memref<8x256xf32, #tpu.memory_space<vmem>>, vector<8x256xf32>
      %c0_12 = arith.constant 0 : index
      %c0_13 = arith.constant 0 : index
      %14 = vector.load %arg3[%c0_12, %c0_13] : memref<1x256xf32, #tpu.memory_space<vmem>>, vector<1x256xf32>
      %15 = vector.broadcast %14 : vector<1x256xf32> to vector<8x256xf32>
      %16 = arith.addf %13, %15 : vector<8x256xf32>
      %cst_14 = arith.constant 0.000000e+00 : f32
      %17 = vector.broadcast %cst_14 : f32 to vector<8x256xf32>
      %18 = arith.cmpf oge, %16, %17 : vector<8x256xf32>
      %cst_15 = arith.constant 2.000000e-01 : f32
      %19 = vector.broadcast %cst_15 : f32 to vector<8x256xf32>
      %20 = arith.mulf %19, %16 : vector<8x256xf32>
      %21 = arith.select %18, %16, %20 : vector<8x256xi1>, vector<8x256xf32>
      %c0_16 = arith.constant 0 : index
      %c0_17 = arith.constant 0 : index
      %22 = vector.load %arg4[%c0_16, %c0_17] : memref<2x256xf32, #tpu.memory_space<vmem>>, vector<1x256xf32>
      %23 = vector.broadcast %22 : vector<1x256xf32> to vector<8x256xf32>
      %24 = arith.mulf %21, %23 : vector<8x256xf32>
      %cst_18 = arith.constant dense<0.000000e+00> : vector<8xf32>
      %25 = vector.multi_reduction <add>, %24, %cst_18 [1] : vector<8x256xf32> to vector<8xf32>
      %26 = vector.shape_cast %25 : vector<8xf32> to vector<8x1xf32>
      %c1 = arith.constant 1 : index
      %c0_19 = arith.constant 0 : index
      %27 = vector.load %arg4[%c1, %c0_19] : memref<2x256xf32, #tpu.memory_space<vmem>>, vector<1x256xf32>
      %28 = vector.broadcast %27 : vector<1x256xf32> to vector<8x256xf32>
      %29 = arith.mulf %21, %28 : vector<8x256xf32>
      %cst_20 = arith.constant dense<0.000000e+00> : vector<8xf32>
      %30 = vector.multi_reduction <add>, %29, %cst_20 [1] : vector<8x256xf32> to vector<8xf32>
      %31 = vector.shape_cast %30 : vector<8xf32> to vector<8x1xf32>
      %32 = tpu.concatenate %26, %31 in 1 : vector<8x1xf32>, vector<8x1xf32> -> vector<8x2xf32>
      %c0_21 = arith.constant 0 : index
      %c0_22 = arith.constant 0 : index
      %33 = vector.load %arg5[%c0_21, %c0_22] : memref<1x2xf32, #tpu.memory_space<vmem>>, vector<1x2xf32>
      %34 = vector.broadcast %33 : vector<1x2xf32> to vector<8x2xf32>
      %35 = arith.addf %32, %34 : vector<8x2xf32>
      %cst_23 = arith.constant 0.000000e+00 : f32
      %36 = vector.broadcast %cst_23 : f32 to vector<8x2xf32>
      %37 = arith.cmpf oge, %35, %36 : vector<8x2xf32>
      %cst_24 = arith.constant 2.000000e-01 : f32
      %38 = vector.broadcast %cst_24 : f32 to vector<8x2xf32>
      %39 = arith.mulf %38, %35 : vector<8x2xf32>
      %40 = arith.select %37, %35, %39 : vector<8x2xi1>, vector<8x2xf32>
      %c0_25 = arith.constant 0 : index
      %c0_26 = arith.constant 0 : index
      %41 = vector.load %arg6[%c0_25, %c0_26] : memref<8x2xf32, #tpu.memory_space<vmem>>, vector<8x2xf32>
      tpu.vector_store %arg6[%c0_25, %c0_26], %40 {strides = array<i32>} : memref<8x2xf32, #tpu.memory_space<vmem>>, vector<8x2xf32>,
    } else {
    }
    return
  }
  func.func @transform_0(%arg0: i32) -> (i32, i32) {
    %c0_i32 = arith.constant 0 : i32
    %c0_i32_0 = arith.constant 0 : i32
    return %c0_i32, %arg0 : i32, i32
  }
  func.func @transform_1(%arg0: i32) -> (i32, i32) {
    %c0_i32 = arith.constant 0 : i32
    %c0_i32_0 = arith.constant 0 : i32
    return %arg0, %c0_i32 : i32, i32
  }
  func.func @transform_2(%arg0: i32) -> (i32, i32) {
    %c0_i32 = arith.constant 0 : i32
    %c0_i32_0 = arith.constant 0 : i32
    %c0_i32_1 = arith.constant 0 : i32
    return %c0_i32, %c0_i32_0 : i32, i32
  }
  func.func @transform_3(%arg0: i32) -> (i32, i32) {
    %c0_i32 = arith.constant 0 : i32
    %c0_i32_0 = arith.constant 0 : i32
    %c0_i32_1 = arith.constant 0 : i32
    return %c0_i32, %c0_i32_0 : i32, i32
  }
  func.func @transform_4(%arg0: i32) -> (i32, i32) {
    %c0_i32 = arith.constant 0 : i32
    %c0_i32_0 = arith.constant 0 : i32
    %c0_i32_1 = arith.constant 0 : i32
    return %c0_i32, %c0_i32_0 : i32, i32
  }
  func.func @transform_5(%arg0: i32) -> (i32, i32) {
    %c0_i32 = arith.constant 0 : i32
    %c0_i32_0 = arith.constant 0 : i32
    %c0_i32_1 = arith.constant 0 : i32
    return %c0_i32, %c0_i32_0 : i32, i32
  }
}

</mosaic_0001>

<bundles_post_ra>
// kernel: fdisc_forward.1
= control target key start
LH: loop header
LB: loop body
LE: loop exit
PB: predicated region body
PF: predicated region fallthrough
CT: control target
= control target key end

     0   :  { %10 = vsyncpa [#allocation4], 0  ;;  %s2813_s0 = inlined_call_operand.hbm [shape: f32[8,2048], index: 0, kind: input, shape index: {}]   ;;  %s2814_s1 = inlined_call_operand.hbm [shape: bf16[2048,256], index: 1, kind: input, shape index: {}]   ;;  %s2815_s2 = inlined_call_operand.hbm [shape: f32[1,256], index: 2, kind: input, shape index: {}]   ;;  %s2816_s3 = inlined_call_operand.vmem [shape: f32[2,256], index: 3, kind: input, shape index: {}]   ;;  %s2817_s4 = inlined_call_operand.vmem [shape: f32[1,2], index: 4, kind: input, shape index: {}]   ;;  %s2818_s5 = inlined_call_operand.vmem [shape: f32[8,2], index: 5, kind: output, shape index: {}]  }
   0x1   :  { %11 = vsyncpa [#allocation6], 0  ;;  %s2757_s18 = smov [#allocation5]  }
   0x2   :  { %s27_s19 = sshll.u32 %s2757_s18, 4  ;;  %s28_s19 = int_to_ptr.vmem [resolvable:$true] %s27_s19 }
   0x3   :  { %s2701_s20 = scalar_lea.vmem %s28_s19, 32768  ;;  %p2706_p1 = scmp.lt.s32.totalorder %s28_s19, %s28_s19 }
   0x4   :  { %p2702_p0 = scmp.ne.s32.totalorder %s28_s19, %s2701_s20  ;;  %p2707_p2 = scmp.lt.s32.totalorder %s2701_s20, %s2701_s20 }
   0x6   :  { %p2708_p3 = por %p2707_p2, %p2706_p1 }
   0x8   :  { %p2709_p4 = pnand %p2708_p3, %p2702_p0 }
   0xa   :  { %2712 = shalt.err (!%p2709_p4)
}
   0xb   :  { %s2758_s21 = smov 128   ;;  %s2759_s22 = smov 8  }
   0xc   :  { %33 = dma.hbm_to_vmem [thread:$0]  %s2814_s1, 32768, %s28_s19, [#allocation6], %s2758_s21, %s2758_s21, %s2759_s22  }
   0xd   :  { %s2760_s25 = smov [#allocation3]   ;;  %s2761_s27 = smov [#allocation7]  }
   0xe   :  { %s18_s26 = sshll.u32 %s2760_s25, 4  ;;  %s40_s28 = sshll.u32 %s2761_s27, 4  ;;  %s19_s26 = int_to_ptr.vmem [resolvable:$true] %s18_s26  ;;  %s41_s28 = int_to_ptr.vmem [resolvable:$true] %s40_s28 }
   0xf   :  { %s2721_s29 = scalar_lea.vmem %s19_s26, 2048  ;;  %p2726_p6 = scmp.lt.s32.totalorder %s19_s26, %s19_s26 }
  0x10   :  { %p2722_p5 = scmp.ne.s32.totalorder %s19_s26, %s2721_s29  ;;  %p2727_p7 = scmp.lt.s32.totalorder %s2721_s29, %s2721_s29 }
  0x12   :  { %p2728_p8 = por %p2727_p7, %p2726_p6 }
  0x14   :  { %p2729_p9 = pnand %p2728_p8, %p2722_p5 }
  0x16   :  { %2732 = shalt.err (!%p2729_p9)
}
  0x17   :  { %21 = dma.hbm_to_vmem [thread:$0]  %s2813_s0, 2048, %s19_s26, [#allocation4]  }
  0x18   :  { %s2741_s7 = scalar_lea.vmem %s41_s28, 32  ;;  %p2746_p11 = scmp.lt.s32.totalorder %s41_s28, %s41_s28 }
  0x19   :  { %p2742_p10 = scmp.ne.s32.totalorder %s41_s28, %s2741_s7  ;;  %p2747_p12 = scmp.lt.s32.totalorder %s2741_s7, %s2741_s7 }
  0x1b   :  { %p2748_p13 = por %p2747_p12, %p2746_p11 }
  0x1d   :  { %p2749_p0 = pnand %p2748_p13, %p2742_p10 }
  0x1f   :  { %2752 = shalt.err (!%p2749_p0)
}
  0x20   :  { %43 = dma.hbm_to_vmem [thread:$0]  %s2815_s2, 32, %s41_s28, [#allocation6]  }
  0x21   :  { %2753 = dma.done.wait [#allocation4], 2048  }
  0x22   :  { %2754 = vsyncadd [#allocation4], 4294965248 }
  0x23   :  { %2755 = dma.done.wait [#allocation6], 32800  }
  0x24   :  { %2756 = vsyncadd [#allocation6], 4294934496  ;;  %v2309_v0 = vld [vmem:[#allocation5 + $0x74] ss:$8 sps:$4 sm:$0xff]   ;;  %v2313_v2 = vld [vmem:[#allocation5 + $0x70] ss:$8 sps:$4 sm:$0xff]  }
  0x25   :  { %v2311_v1 = vld [vmem:[#allocation5 + $0x174] ss:$8 sps:$4 sm:$0xff]   ;;  %1633 = vmatprep.subr.bf16.mxu0 %v2309_v0  ;;  %v2314_v3 = vld [vmem:[#allocation5 + $0x170] ss:$8 sps:$4 sm:$0xff]   ;;  %v2315_v4 = vld [vmem:[#allocation5 + $0x64] ss:$8 sps:$4 sm:$0xff]  }
  0x26   :  { %1674 = vmatprep.subr.bf16.mxu1 %v2311_v1  ;;  %1634 = vmatpush1.bf16.msra.mxu0 %v2313_v2  ;;  %v2317_v5 = vld [vmem:[#allocation5 + $0x164] ss:$8 sps:$4 sm:$0xff]   ;;  %v2319_v6 = vld [vmem:[#allocation5 + $0x60] ss:$8 sps:$4 sm:$0xff]   ;;  %v2321_v8 = vld [vmem:[#allocation5 + $0x54] ss:$8 sps:$4 sm:$0xff]  }
  0x27   :  { %1675 = vmatpush1.bf16.msra.mxu1 %v2314_v3  ;;  %1635 = vmatprep.subr.bf16.mxu0 %v2315_v4  ;;  %v2320_v7 = vld [vmem:[#allocation5 + $0x160] ss:$8 sps:$4 sm:$0xff]   ;;  %v2323_v9 = vld [vmem:[#allocation5 + $0x154] ss:$8 sps:$4 sm:$0xff]   ;;  %v2325_v10 = vld [vmem:[#allocation5 + $0x50] ss:$8 sps:$4 sm:$0xff]  }
  0x28   :  { %1676 = vmatprep.subr.bf16.mxu1 %v2317_v5  ;;  %v2326_v11 = vld [vmem:[#allocation5 + $0x150] ss:$8 sps:$4 sm:$0xff]   ;;  %v2327_v12 = vld [vmem:[#allocation5 + $0x44] ss:$8 sps:$4 sm:$0xff]   ;;  %v2331_v14 = vld [vmem:[#allocation5 + $0x40] ss:$8 sps:$4 sm:$0xff]  }
  0x29   :  { %v2329_v13 = vld [vmem:[#allocation5 + $0x144] ss:$8 sps:$4 sm:$0xff]   ;;  %v2332_v15 = vld [vmem:[#allocation5 + $0x140] ss:$8 sps:$4 sm:$0xff]   ;;  %v2333_v16 = vld [vmem:[#allocation5 + $0x34] ss:$8 sps:$4 sm:$0xff]  }
  0x2a   :  { %1636 = vmatpush1.bf16.msra.mxu0 %v2319_v6  ;;  %v2335_v17 = vld [vmem:[#allocation5 + $0x134] ss:$8 sps:$4 sm:$0xff]   ;;  %v2337_v18 = vld [vmem:[#allocation5 + $0x30] ss:$8 sps:$4 sm:$0xff]   ;;  %v2339_v20 = vld [vmem:[#allocation5 + $0x24] ss:$8 sps:$4 sm:$0xff]  }
  0x2b   :  { %1677 = vmatpush1.bf16.msra.mxu1 %v2320_v7  ;;  %1637 = vmatprep.subr.bf16.mxu0 %v2321_v8  ;;  %v2338_v19 = vld [vmem:[#allocation5 + $0x130] ss:$8 sps:$4 sm:$0xff]   ;;  %v2341_v21 = vld [vmem:[#allocation5 + $0x124] ss:$8 sps:$4 sm:$0xff]   ;;  %v2343_v22 = vld [vmem:[#allocation5 + $0x20] ss:$8 sps:$4 sm:$0xff]  }
  0x2c   :  { %1678 = vmatprep.subr.bf16.mxu1 %v2323_v9  ;;  %v2344_v23 = vld [vmem:[#allocation5 + $0x120] ss:$8 sps:$4 sm:$0xff]   ;;  %v2345_v24 = vld [vmem:[#allocation5 + $0x14] ss:$8 sps:$4 sm:$0xff]   ;;  %v2349_v26 = vld [vmem:[#allocation5 + $0x10] ss:$8 sps:$4 sm:$0xff]  }
  0x2d   :  { %v2347_v25 = vld [vmem:[#allocation5 + $0x114] ss:$8 sps:$4 sm:$0xff]   ;;  %v2350_v27 = vld [vmem:[#allocation5 + $0x110] ss:$8 sps:$4 sm:$0xff]   ;;  %v2351_v28 = vld [vmem:[#allocation5 + $0x4] ss:$8 sps:$4 sm:$0xff]  }
  0x2e   :  { %1638 = vmatpush1.bf16.msra.mxu0 %v2325_v10  ;;  %v2353_v29 = vld [vmem:[#allocation5 + $0x104] ss:$8 sps:$4 sm:$0xff]   ;;  %v2355_v30 = vld [vmem:[#allocation5] ss:$8 sps:$4 sm:$0xff]   ;;  %v2357_v32 = vld [vmem:[#allocation5 + $0xf4] ss:$8 sps:$4 sm:$0xff]  }
  0x2f   :  { %1679 = vmatpush1.bf16.msra.mxu1 %v2326_v11  ;;  %1639 = vmatprep.subr.bf16.mxu0 %v2327_v12  ;;  %v2356_v31 = vld [vmem:[#allocation5 + $0x100] ss:$8 sps:$4 sm:$0xff]   ;;  %v2359_v33 = vld [vmem:[#allocation5 + $0x1f4] ss:$8 sps:$4 sm:$0xff]   ;;  %v2361_v34 = vld [vmem:[#allocation5 + $0xf0] ss:$8 sps:$4 sm:$0xff]  }
  0x30   :  { %1680 = vmatprep.subr.bf16.mxu1 %v2329_v13  ;;  %v2362_v35 = vld [vmem:[#allocation5 + $0x1f0] ss:$8 sps:$4 sm:$0xff]   ;;  %v2363_v36 = vld [vmem:[#allocation5 + $0xe4] ss:$8 sps:$4 sm:$0xff]   ;;  %v2367_v38 = vld [vmem:[#allocation5 + $0xe0] ss:$8 sps:$4 sm:$0xff]  }
  0x31   :  { %v2365_v37 = vld [vmem:[#allocation5 + $0x1e4] ss:$8 sps:$4 sm:$0xff]   ;;  %v2368_v39 = vld [vmem:[#allocation5 + $0x1e0] ss:$8 sps:$4 sm:$0xff]   ;;  %v2369_v40 = vld [vmem:[#allocation5 + $0xd4] ss:$8 sps:$4 sm:$0xff]  }
  0x32   :  { %1640 = vmatpush1.bf16.msra.mxu0 %v2331_v14  ;;  %v2371_v41 = vld [vmem:[#allocation5 + $0x1d4] ss:$8 sps:$4 sm:$0xff]   ;;  %v2373_v42 = vld [vmem:[#allocation5 + $0xd0] ss:$8 sps:$4 sm:$0xff]   ;;  %v2375_v44 = vld [vmem:[#allocation5 + $0xc4] ss:$8 sps:$4 sm:$0xff]  }
  0x33   :  { %1681 = vmatpush1.bf16.msra.mxu1 %v2332_v15  ;;  %1641 = vmatprep.subr.bf16.mxu0 %v2333_v16  ;;  %v2374_v43 = vld [vmem:[#allocation5 + $0x1d0] ss:$8 sps:$4 sm:$0xff]   ;;  %v2377_v45 = vld [vmem:[#allocation5 + $0x1c4] ss:$8 sps:$4 sm:$0xff]   ;;  %v2379_v47 = vld [vmem:[#allocation5 + $0xc0] ss:$8 sps:$4 sm:$0xff]  }
  0x34   :  { %1682 = vmatprep.subr.bf16.mxu1 %v2335_v17  ;;  %v66_v46 = vld [vmem:[#allocation3 + $0x8] sm:$0xff]  ;;  %v68_v50 = vld [vmem:[#allocation3 + $0x18] sm:$0xff]  ;;  %v65_v4 = vld [vmem:[#allocation3] sm:$0xff]  ;;  %vm2025_vm2 = vcmask 7168   ;;  %vm2038_vm3 = vcmask 15360  }
  0x35   :  { %v2380_v48 = vld [vmem:[#allocation5 + $0x1c0] ss:$8 sps:$4 sm:$0xff]   ;;  %v82_v49 = vpack.c.bf16 %v66_v46, %v66_v46  ;;  %v2381_v51 = vld [vmem:[#allocation5 + $0xb4] ss:$8 sps:$4 sm:$0xff]   ;;  %v84_v52 = vpack.c.bf16 %v68_v50, %v68_v50  ;;  %v2385_v54 = vld [vmem:[#allocation5 + $0xb0] ss:$8 sps:$4 sm:$0xff]   ;;  %v81_v8 = vpack.c.bf16 %v65_v4, %v65_v4 }
  0x36   :  { %1642 = vmatpush1.bf16.msra.mxu0 %v2337_v18  ;;  %v2383_v53 = vld [vmem:[#allocation5 + $0x1b4] ss:$8 sps:$4 sm:$0xff]   ;;  %v2386_v55 = vld [vmem:[#allocation5 + $0x1b0] ss:$8 sps:$4 sm:$0xff]   ;;  %v2387_v56 = vld [vmem:[#allocation5 + $0xa4] ss:$8 sps:$4 sm:$0xff]  }
  0x37   :  { %1683 = vmatpush1.bf16.msra.mxu1 %v2338_v19  ;;  %1643 = vmatprep.subr.bf16.mxu0 %v2339_v20  ;;  %v2389_v57 = vld [vmem:[#allocation5 + $0x1a4] ss:$8 sps:$4 sm:$0xff]   ;;  %v2391_v58 = vld [vmem:[#allocation5 + $0xa0] ss:$8 sps:$4 sm:$0xff]   ;;  %v2393_v60 = vld [vmem:[#allocation5 + $0x94] ss:$8 sps:$4 sm:$0xff]  }
  0x38   :  { %1684 = vmatprep.subr.bf16.mxu1 %v2341_v21  ;;  %1665 = vmatprep.mubr.bf16.mxu0 %v82_v49  ;;  %v2392_v59 = vld [vmem:[#allocation5 + $0x1a0] ss:$8 sps:$4 sm:$0xff]   ;;  %v2395_v61 = vld [vmem:[#allocation5 + $0x194] ss:$8 sps:$4 sm:$0xff]   ;;  %v2397_v62 = vld [vmem:[#allocation5 + $0x90] ss:$8 sps:$4 sm:$0xff]  }
  0x39   :  { %1706 = vmatprep.mubr.bf16.mxu1 %v84_v52  ;;  %v2398_v63 = vld [vmem:[#allocation5 + $0x190] ss:$8 sps:$4 sm:$0xff]   ;;  %v2399_v0 = vld [vmem:[#allocation5 + $0x84] ss:$8 sps:$4 sm:$0xff]   ;;  %v2403_v2 = vld [vmem:[#allocation5 + $0x80] ss:$8 sps:$4 sm:$0xff]  }
  0x3a   :  { %1644 = vmatpush1.bf16.msra.mxu0 %v2343_v22  ;;  %v2401_v1 = vld [vmem:[#allocation5 + $0x184] ss:$8 sps:$4 sm:$0xff]   ;;  %v2404_v3 = vld [vmem:[#allocation5 + $0x180] ss:$8 sps:$4 sm:$0xff]   ;;  %v67_v5 = vld [vmem:[#allocation3 + $0x10] sm:$0xff] }
  0x3b   :  { %1685 = vmatpush1.bf16.msra.mxu1 %v2344_v23  ;;  %1645 = vmatprep.subr.bf16.mxu0 %v2345_v24  ;;  %v2407_v6 = vld [vmem:[#allocation5 + $0x274] ss:$8 sps:$4 sm:$0xff]   ;;  %v83_v9 = vpack.c.bf16 %v67_v5, %v67_v5  ;;  %v2405_v10 = vld [vmem:[#allocation5 + $0x270] ss:$8 sps:$4 sm:$0xff]   ;;  %v2413_v12 = vld [vmem:[#allocation5 + $0x264] ss:$8 sps:$4 sm:$0xff]  }
  0x3c   :  { %1686 = vmatprep.subr.bf16.mxu1 %v2347_v25  ;;  %v2410_v7 = vld [vmem:[#allocation5 + $0x374] ss:$8 sps:$4 sm:$0xff]   ;;  %v2408_v11 = vld [vmem:[#allocation5 + $0x370] ss:$8 sps:$4 sm:$0xff]   ;;  %v2416_v13 = vld [vmem:[#allocation5 + $0x364] ss:$8 sps:$4 sm:$0xff]  }
  0x3d   :  { %v2411_v14 = vld [vmem:[#allocation5 + $0x260] ss:$8 sps:$4 sm:$0xff]   ;;  %v2419_v16 = vld [vmem:[#allocation5 + $0x254] ss:$8 sps:$4 sm:$0xff]   ;;  %v2417_v18 = vld [vmem:[#allocation5 + $0x250] ss:$8 sps:$4 sm:$0xff]  }
  0x3e   :  { %1646 = vmatpush1.bf16.msra.mxu0 %v2349_v26  ;;  %v2414_v15 = vld [vmem:[#allocation5 + $0x360] ss:$8 sps:$4 sm:$0xff]   ;;  %v2422_v17 = vld [vmem:[#allocation5 + $0x354] ss:$8 sps:$4 sm:$0xff]   ;;  %v2420_v19 = vld [vmem:[#allocation5 + $0x350] ss:$8 sps:$4 sm:$0xff]  }
  0x3f   :  { %1687 = vmatpush1.bf16.msra.mxu1 %v2350_v27  ;;  %1647 = vmatprep.subr.bf16.mxu0 %v2351_v28  ;;  %v2425_v20 = vld [vmem:[#allocation5 + $0x244] ss:$8 sps:$4 sm:$0xff]   ;;  %v2423_v22 = vld [vmem:[#allocation5 + $0x240] ss:$8 sps:$4 sm:$0xff]   ;;  %v2431_v24 = vld [vmem:[#allocation5 + $0x234] ss:$8 sps:$4 sm:$0xff]  }
  0x40   :  { %1688 = vmatprep.subr.bf16.mxu1 %v2353_v29  ;;  %v2428_v21 = vld [vmem:[#allocation5 + $0x344] ss:$8 sps:$4 sm:$0xff]   ;;  %v2426_v23 = vld [vmem:[#allocation5 + $0x340] ss:$8 sps:$4 sm:$0xff]   ;;  %v2434_v25 = vld [vmem:[#allocation5 + $0x334] ss:$8 sps:$4 sm:$0xff]  }
  0x41   :  { %v2429_v26 = vld [vmem:[#allocation5 + $0x230] ss:$8 sps:$4 sm:$0xff]   ;;  %v2437_v28 = vld [vmem:[#allocation5 + $0x224] ss:$8 sps:$4 sm:$0xff]   ;;  %v2459_v50 = vld [vmem:[#allocation5 + $0x2e0] ss:$8 sps:$4 sm:$0xff]  }
  0x42   :  { %1648 = vmatpush1.bf16.msra.mxu0 %v2355_v30  ;;  %v2432_v27 = vld [vmem:[#allocation5 + $0x330] ss:$8 sps:$4 sm:$0xff]   ;;  %v2440_v29 = vld [vmem:[#allocation5 + $0x324] ss:$8 sps:$4 sm:$0xff]   ;;  %v2435_v30 = vld [vmem:[#allocation5 + $0x220] ss:$8 sps:$4 sm:$0xff]  }
  0x43   :  { %1689 = vmatpush1.bf16.msra.mxu1 %v2356_v31  ;;  %1649 = vmatprep.subr.bf16.mxu0 %v2357_v32  ;;  %v2438_v31 = vld [vmem:[#allocation5 + $0x320] ss:$8 sps:$4 sm:$0xff]   ;;  %v2443_v32 = vld [vmem:[#allocation5 + $0x214] ss:$8 sps:$4 sm:$0xff]   ;;  %v2453_v46 = vld [vmem:[#allocation5 + $0x2f0] ss:$8 sps:$4 sm:$0xff]  }
  0x44   :  { %1690 = vmatprep.subr.bf16.mxu1 %v2359_v33  ;;  %v2446_v33 = vld [vmem:[#allocation5 + $0x314] ss:$8 sps:$4 sm:$0xff]   ;;  %v2464_v49 = vld [vmem:[#allocation5 + $0x3e4] ss:$8 sps:$4 sm:$0xff]  }
  0x45   :  { %v2467_v52 = vld [vmem:[#allocation5 + $0x2d4] ss:$8 sps:$4 sm:$0xff]  }
  0x46   :  { %1650 = vmatpush2.bf16.msra.mxu0 %v2361_v34  ;;  %v70_v34 = vld [vmem:[#allocation3 + $0x28] sm:$0xff]  ;;  %v2491_v4 = vld [vmem:[#allocation5 + $0x294] ss:$8 sps:$4 sm:$0xff]  }
  0x47   :  { %1691 = vmatpush2.bf16.msra.mxu1 %v2362_v35  ;;  %1651 = vmatprep.subr.bf16.mxu0 %v2363_v36  ;;  %v2441_v35 = vld [vmem:[#allocation5 + $0x210] ss:$8 sps:$4 sm:$0xff]   ;;  %v2494_v5 = vld [vmem:[#allocation5 + $0x394] ss:$8 sps:$4 sm:$0xff]  }
  0x48   :  { %1692 = vmatprep.subr.bf16.mxu1 %v2365_v37  ;;  %v2444_v36 = vld [vmem:[#allocation5 + $0x310] ss:$8 sps:$4 sm:$0xff]   ;;  %v86_v37 = vpack.c.bf16 %v70_v34, %v70_v34  ;;  %v2519_v34 = vld [vmem:[#allocation5 + $0x440] ss:$8 sps:$4 sm:$0xff]  }
  0x4a   :  { %1652 = vmatpush2.bf16.msra.mxu0 %v2367_v38  ;;  %v72_v38 = vld [vmem:[#allocation3 + $0x38] sm:$0xff] }
  0x4b   :  { %1693 = vmatpush2.bf16.msra.mxu1 %v2368_v39  ;;  %1653 = vmatprep.subr.bf16.mxu0 %v2369_v40  ;;  %v2449_v39 = vld [vmem:[#allocation5 + $0x204] ss:$8 sps:$4 sm:$0xff]   ;;  %v88_v40 = vpack.c.bf16 %v72_v38, %v72_v38  ;;  %v2525_v38 = vld [vmem:[#allocation5 + $0x430] ss:$8 sps:$4 sm:$0xff]  }
  0x4c   :  { %1694 = vmatprep.subr.bf16.mxu1 %v2371_v41  ;;  %v2452_v41 = vld [vmem:[#allocation5 + $0x304] ss:$8 sps:$4 sm:$0xff]  }
  0x4e   :  { %1654 = vmatpush2.bf16.msra.mxu0 %v2373_v42  ;;  %v2447_v42 = vld [vmem:[#allocation5 + $0x200] ss:$8 sps:$4 sm:$0xff]  }
  0x4f   :  { %1695 = vmatpush2.bf16.msra.mxu1 %v2374_v43  ;;  %1655 = vmatprep.subr.bf16.mxu0 %v2375_v44  ;;  %v2450_v43 = vld [vmem:[#allocation5 + $0x300] ss:$8 sps:$4 sm:$0xff]   ;;  %v2455_v44 = vld [vmem:[#allocation5 + $0x2f4] ss:$8 sps:$4 sm:$0xff]  }
  0x50   :  { %1696 = vmatprep.subr.bf16.mxu1 %v2377_v45  ;;  %v2458_v45 = vld [vmem:[#allocation5 + $0x3f4] ss:$8 sps:$4 sm:$0xff]  }
  0x52   :  { %1656 = vmatpush2.bf16.msra.mxu0 %v2379_v47  ;;  %v2456_v47 = vld [vmem:[#allocation5 + $0x3f0] ss:$8 sps:$4 sm:$0xff]  }
  0x53   :  { %1697 = vmatpush2.bf16.msra.mxu1 %v2380_v48  ;;  %1657 = vmatprep.subr.bf16.mxu0 %v2381_v51  ;;  %v2461_v48 = vld [vmem:[#allocation5 + $0x2e4] ss:$8 sps:$4 sm:$0xff]   ;;  %v2462_v51 = vld [vmem:[#allocation5 + $0x3e0] ss:$8 sps:$4 sm:$0xff]  }
  0x54   :  { %1698 = vmatprep.subr.bf16.mxu1 %v2383_v53  ;;  %v2470_v53 = vld [vmem:[#allocation5 + $0x3d4] ss:$8 sps:$4 sm:$0xff]  }
  0x56   :  { %1658 = vmatpush2.bf16.msra.mxu0 %v2385_v54  ;;  %v2465_v54 = vld [vmem:[#allocation5 + $0x2d0] ss:$8 sps:$4 sm:$0xff]  }
  0x57   :  { %1699 = vmatpush2.bf16.msra.mxu1 %v2386_v55  ;;  %1659 = vmatprep.subr.bf16.mxu0 %v2387_v56  ;;  %v2468_v55 = vld [vmem:[#allocation5 + $0x3d0] ss:$8 sps:$4 sm:$0xff]   ;;  %v2473_v56 = vld [vmem:[#allocation5 + $0x2c4] ss:$8 sps:$4 sm:$0xff]  }
  0x58   :  { %1700 = vmatprep.subr.bf16.mxu1 %v2389_v57  ;;  %v2476_v57 = vld [vmem:[#allocation5 + $0x3c4] ss:$8 sps:$4 sm:$0xff]  }
  0x5a   :  { %1660 = vmatpush2.bf16.msra.mxu0 %v2391_v58  ;;  %v2471_v58 = vld [vmem:[#allocation5 + $0x2c0] ss:$8 sps:$4 sm:$0xff]  }
  0x5b   :  { %1701 = vmatpush2.bf16.msra.mxu1 %v2392_v59  ;;  %1661 = vmatprep.subr.bf16.mxu0 %v2393_v60  ;;  %v2474_v59 = vld [vmem:[#allocation5 + $0x3c0] ss:$8 sps:$4 sm:$0xff]   ;;  %v2479_v60 = vld [vmem:[#allocation5 + $0x2b4] ss:$8 sps:$4 sm:$0xff]  }
  0x5c   :  { %1702 = vmatprep.subr.bf16.mxu1 %v2395_v61  ;;  %v2482_v61 = vld [vmem:[#allocation5 + $0x3b4] ss:$8 sps:$4 sm:$0xff]  }
  0x5e   :  { %1662 = vmatpush2.bf16.msra.mxu0 %v2397_v62  ;;  %v2477_v62 = vld [vmem:[#allocation5 + $0x2b0] ss:$8 sps:$4 sm:$0xff]  }
  0x5f   :  { %1703 = vmatpush2.bf16.msra.mxu1 %v2398_v63  ;;  %1663 = vmatprep.subr.bf16.mxu0 %v2399_v0  ;;  %v2480_v63 = vld [vmem:[#allocation5 + $0x3b0] ss:$8 sps:$4 sm:$0xff]   ;;  %v2485_v0 = vld [vmem:[#allocation5 + $0x2a4] ss:$8 sps:$4 sm:$0xff]  }
  0x60   :  { %1704 = vmatprep.subr.bf16.mxu1 %v2401_v1  ;;  %v2488_v1 = vld [vmem:[#allocation5 + $0x3a4] ss:$8 sps:$4 sm:$0xff]  }
  0x62   :  { %1664 = vmatpush2.bf16.msra.mxu0 %v2403_v2  ;;  %v2483_v2 = vld [vmem:[#allocation5 + $0x2a0] ss:$8 sps:$4 sm:$0xff]  }
  0x63   :  { %1705 = vmatpush2.bf16.msra.mxu1 %v2404_v3  ;;  %1715 = vmatprep.subr.bf16.mxu0 %v2407_v6  ;;  %v2486_v3 = vld [vmem:[#allocation5 + $0x3a0] ss:$8 sps:$4 sm:$0xff]   ;;  %v2489_v6 = vld [vmem:[#allocation5 + $0x290] ss:$8 sps:$4 sm:$0xff]  }
  0x64   :  { %1756 = vmatprep.subr.bf16.mxu1 %v2410_v7  ;;  %v2492_v7 = vld [vmem:[#allocation5 + $0x390] ss:$8 sps:$4 sm:$0xff]  }
  0x65   :  { %1666 = vmatmul.mubr.bf16.vlgmr.msra.gmra.mxu0 %v81_v8  ;;  %v2497_v8 = vld [vmem:[#allocation5 + $0x284] ss:$8 sps:$4 sm:$0xff]  }
  0x66   :  { %1707 = vmatmul.mubr.bf16.vlgmr.msra.gmra.mxu1 %v83_v9  ;;  %1716 = vmatpush1.bf16.msra.mxu0 %v2405_v10  ;;  %v2500_v9 = vld [vmem:[#allocation5 + $0x384] ss:$8 sps:$4 sm:$0xff]   ;;  %v2495_v10 = vld [vmem:[#allocation5 + $0x280] ss:$8 sps:$4 sm:$0xff]  }
  0x67   :  { %1757 = vmatpush1.bf16.msra.mxu1 %v2408_v11  ;;  %1717 = vmatprep.subr.bf16.mxu0 %v2413_v12  ;;  %v2498_v11 = vld [vmem:[#allocation5 + $0x380] ss:$8 sps:$4 sm:$0xff]  }
  0x68   :  { %1758 = vmatprep.subr.bf16.mxu1 %v2416_v13  ;;  %1747 = vmatprep.mubr.bf16.mxu0 %v86_v37  ;;  %v69_v12 = vld [vmem:[#allocation3 + $0x20] sm:$0xff]  ;;  %v71_v13 = vld [vmem:[#allocation3 + $0x30] sm:$0xff] }
  0x69   :  { %1788 = vmatprep.mubr.bf16.mxu1 %v88_v40  ;;  %v2530_v37 = vld [vmem:[#allocation5 + $0x534] ss:$8 sps:$4 sm:$0xff]   ;;  %v2533_v40 = vld [vmem:[#allocation5 + $0x424] ss:$8 sps:$4 sm:$0xff]  }
  0x6a   :  { %1718 = vmatpush1.bf16.msra.mxu0 %v2411_v14  ;;  %v2503_v14 = vld [vmem:[#allocation5 + $0x474] ss:$8 sps:$4 sm:$0xff]  }
  0x6b   :  { %1759 = vmatpush1.bf16.msra.mxu1 %v2414_v15  ;;  %1719 = vmatprep.subr.bf16.mxu0 %v2419_v16  ;;  %v2506_v15 = vld [vmem:[#allocation5 + $0x574] ss:$8 sps:$4 sm:$0xff]   ;;  %v85_v16 = vpack.c.bf16 %v69_v12, %v69_v12 }
  0x6c   :  { %1760 = vmatprep.subr.bf16.mxu1 %v2422_v17  ;;  %v87_v17 = vpack.c.bf16 %v71_v13, %v71_v13  ;;  %v2587_v12 = vld [vmem:[#allocation5 + $0x494] ss:$8 sps:$4 sm:$0xff]  }
  0x6d   :  { %v2590_v13 = vld [vmem:[#allocation5 + $0x594] ss:$8 sps:$4 sm:$0xff]  }
  0x6e   :  { %1720 = vmatpush1.bf16.msra.mxu0 %v2417_v18  ;;  %v2501_v18 = vld [vmem:[#allocation5 + $0x470] ss:$8 sps:$4 sm:$0xff]  }
  0x6f   :  { %1761 = vmatpush1.bf16.msra.mxu1 %v2420_v19  ;;  %1721 = vmatprep.subr.bf16.mxu0 %v2425_v20  ;;  %v2504_v19 = vld [vmem:[#allocation5 + $0x570] ss:$8 sps:$4 sm:$0xff]   ;;  %v2509_v20 = vld [vmem:[#allocation5 + $0x464] ss:$8 sps:$4 sm:$0xff]  }
  0x70   :  { %1762 = vmatprep.subr.bf16.mxu1 %v2428_v21  ;;  %v2512_v21 = vld [vmem:[#allocation5 + $0x564] ss:$8 sps:$4 sm:$0xff]  }
  0x72   :  { %1722 = vmatpush1.bf16.msra.mxu0 %v2423_v22  ;;  %v74_v22 = vld [vmem:[#allocation3 + $0x48] sm:$0xff] }
  0x73   :  { %1763 = vmatpush1.bf16.msra.mxu1 %v2426_v23  ;;  %1723 = vmatprep.subr.bf16.mxu0 %v2431_v24  ;;  %v2507_v23 = vld [vmem:[#allocation5 + $0x460] ss:$8 sps:$4 sm:$0xff]  }
  0x74   :  { %1764 = vmatprep.subr.bf16.mxu1 %v2434_v25  ;;  %v2510_v24 = vld [vmem:[#allocation5 + $0x560] ss:$8 sps:$4 sm:$0xff]   ;;  %v90_v25 = vpack.c.bf16 %v74_v22, %v74_v22  ;;  %v2599_v22 = vld [vmem:[#allocation5 + $0x674] ss:$8 sps:$4 sm:$0xff]  }
  0x76   :  { %1724 = vmatpush1.bf16.msra.mxu0 %v2429_v26  ;;  %v76_v26 = vld [vmem:[#allocation3 + $0x58] sm:$0xff] }
  0x77   :  { %1765 = vmatpush1.bf16.msra.mxu1 %v2432_v27  ;;  %1725 = vmatprep.subr.bf16.mxu0 %v2437_v28  ;;  %v2515_v27 = vld [vmem:[#allocation5 + $0x454] ss:$8 sps:$4 sm:$0xff]   ;;  %v92_v28 = vpack.c.bf16 %v76_v26, %v76_v26  ;;  %v78_v26 = vld [vmem:[#allocation3 + $0x68] sm:$0xff] }
  0x78   :  { %1766 = vmatprep.subr.bf16.mxu1 %v2440_v29  ;;  %v2518_v29 = vld [vmem:[#allocation5 + $0x554] ss:$8 sps:$4 sm:$0xff]  }
  0x7a   :  { %1726 = vmatpush1.bf16.msra.mxu0 %v2435_v30  ;;  %v2513_v30 = vld [vmem:[#allocation5 + $0x450] ss:$8 sps:$4 sm:$0xff]  }
  0x7b   :  { %1767 = vmatpush1.bf16.msra.mxu1 %v2438_v31  ;;  %1727 = vmatprep.subr.bf16.mxu0 %v2443_v32  ;;  %v2516_v31 = vld [vmem:[#allocation5 + $0x550] ss:$8 sps:$4 sm:$0xff]   ;;  %v2521_v32 = vld [vmem:[#allocation5 + $0x444] ss:$8 sps:$4 sm:$0xff]  }
  0x7c   :  { %1768 = vmatprep.subr.bf16.mxu1 %v2446_v33  ;;  %v2524_v33 = vld [vmem:[#allocation5 + $0x544] ss:$8 sps:$4 sm:$0xff]  }
  0x7e   :  { %1728 = vmatpush1.bf16.msra.mxu0 %v2441_v35  ;;  %v2522_v35 = vld [vmem:[#allocation5 + $0x540] ss:$8 sps:$4 sm:$0xff]  }
  0x7f   :  { %1769 = vmatpush1.bf16.msra.mxu1 %v2444_v36  ;;  %1729 = vmatprep.subr.bf16.mxu0 %v2449_v39  ;;  %v2527_v36 = vld [vmem:[#allocation5 + $0x434] ss:$8 sps:$4 sm:$0xff]   ;;  %v2528_v39 = vld [vmem:[#allocation5 + $0x530] ss:$8 sps:$4 sm:$0xff]  }
  0x80   :  { %1770 = vmatprep.subr.bf16.mxu1 %v2452_v41  ;;  %v2536_v41 = vld [vmem:[#allocation5 + $0x524] ss:$8 sps:$4 sm:$0xff]  }
  0x82   :  { %1730 = vmatpush1.bf16.msra.mxu0 %v2447_v42  ;;  %v2531_v42 = vld [vmem:[#allocation5 + $0x420] ss:$8 sps:$4 sm:$0xff]  }
  0x83   :  { %1771 = vmatpush1.bf16.msra.mxu1 %v2450_v43  ;;  %1731 = vmatprep.subr.bf16.mxu0 %v2455_v44  ;;  %v2534_v43 = vld [vmem:[#allocation5 + $0x520] ss:$8 sps:$4 sm:$0xff]   ;;  %v2539_v44 = vld [vmem:[#allocation5 + $0x414] ss:$8 sps:$4 sm:$0xff]  }
  0x84   :  { %1772 = vmatprep.subr.bf16.mxu1 %v2458_v45  ;;  %v2542_v45 = vld [vmem:[#allocation5 + $0x514] ss:$8 sps:$4 sm:$0xff]  }
  0x86   :  { %1732 = vmatpush2.bf16.msra.mxu0 %v2453_v46  ;;  %v2537_v46 = vld [vmem:[#allocation5 + $0x410] ss:$8 sps:$4 sm:$0xff]  }
  0x87   :  { %1773 = vmatpush2.bf16.msra.mxu1 %v2456_v47  ;;  %1733 = vmatprep.subr.bf16.mxu0 %v2461_v48  ;;  %v2540_v47 = vld [vmem:[#allocation5 + $0x510] ss:$8 sps:$4 sm:$0xff]   ;;  %v2545_v48 = vld [vmem:[#allocation5 + $0x404] ss:$8 sps:$4 sm:$0xff]  }
  0x88   :  { %1774 = vmatprep.subr.bf16.mxu1 %v2464_v49  ;;  %v2548_v49 = vld [vmem:[#allocation5 + $0x504] ss:$8 sps:$4 sm:$0xff]  }
  0x8a   :  { %1734 = vmatpush2.bf16.msra.mxu0 %v2459_v50  ;;  %v2543_v50 = vld [vmem:[#allocation5 + $0x400] ss:$8 sps:$4 sm:$0xff]  }
  0x8b   :  { %1775 = vmatpush2.bf16.msra.mxu1 %v2462_v51  ;;  %1735 = vmatprep.subr.bf16.mxu0 %v2467_v52  ;;  %v2546_v51 = vld [vmem:[#allocation5 + $0x500] ss:$8 sps:$4 sm:$0xff]   ;;  %v2551_v52 = vld [vmem:[#allocation5 + $0x4f4] ss:$8 sps:$4 sm:$0xff]  }
  0x8c   :  { %1776 = vmatprep.subr.bf16.mxu1 %v2470_v53  ;;  %v2554_v53 = vld [vmem:[#allocation5 + $0x5f4] ss:$8 sps:$4 sm:$0xff]  }
  0x8e   :  { %1736 = vmatpush2.bf16.msra.mxu0 %v2465_v54  ;;  %v2549_v54 = vld [vmem:[#allocation5 + $0x4f0] ss:$8 sps:$4 sm:$0xff]  }
  0x8f   :  { %1777 = vmatpush2.bf16.msra.mxu1 %v2468_v55  ;;  %1737 = vmatprep.subr.bf16.mxu0 %v2473_v56  ;;  %v2552_v55 = vld [vmem:[#allocation5 + $0x5f0] ss:$8 sps:$4 sm:$0xff]   ;;  %v2557_v56 = vld [vmem:[#allocation5 + $0x4e4] ss:$8 sps:$4 sm:$0xff]  }
  0x90   :  { %1778 = vmatprep.subr.bf16.mxu1 %v2476_v57  ;;  %v2560_v57 = vld [vmem:[#allocation5 + $0x5e4] ss:$8 sps:$4 sm:$0xff]  }
  0x92   :  { %1738 = vmatpush2.bf16.msra.mxu0 %v2471_v58  ;;  %v2555_v58 = vld [vmem:[#allocation5 + $0x4e0] ss:$8 sps:$4 sm:$0xff]  }
  0x93   :  { %1779 = vmatpush2.bf16.msra.mxu1 %v2474_v59  ;;  %1739 = vmatprep.subr.bf16.mxu0 %v2479_v60  ;;  %v2558_v59 = vld [vmem:[#allocation5 + $0x5e0] ss:$8 sps:$4 sm:$0xff]   ;;  %v2563_v60 = vld [vmem:[#allocation5 + $0x4d4] ss:$8 sps:$4 sm:$0xff]  }
  0x94   :  { %1780 = vmatprep.subr.bf16.mxu1 %v2482_v61  ;;  %v2566_v61 = vld [vmem:[#allocation5 + $0x5d4] ss:$8 sps:$4 sm:$0xff]  }
  0x96   :  { %1740 = vmatpush2.bf16.msra.mxu0 %v2477_v62  ;;  %v2561_v62 = vld [vmem:[#allocation5 + $0x4d0] ss:$8 sps:$4 sm:$0xff]  }
  0x97   :  { %1781 = vmatpush2.bf16.msra.mxu1 %v2480_v63  ;;  %1741 = vmatprep.subr.bf16.mxu0 %v2485_v0  ;;  %v2564_v63 = vld [vmem:[#allocation5 + $0x5d0] ss:$8 sps:$4 sm:$0xff]   ;;  %v2569_v0 = vld [vmem:[#allocation5 + $0x4c4] ss:$8 sps:$4 sm:$0xff]  }
  0x98   :  { %1782 = vmatprep.subr.bf16.mxu1 %v2488_v1  ;;  %v2572_v1 = vld [vmem:[#allocation5 + $0x5c4] ss:$8 sps:$4 sm:$0xff]  }
  0x9a   :  { %1742 = vmatpush2.bf16.msra.mxu0 %v2483_v2  ;;  %v2567_v2 = vld [vmem:[#allocation5 + $0x4c0] ss:$8 sps:$4 sm:$0xff]  }
  0x9b   :  { %1783 = vmatpush2.bf16.msra.mxu1 %v2486_v3  ;;  %1743 = vmatprep.subr.bf16.mxu0 %v2491_v4  ;;  %v2570_v3 = vld [vmem:[#allocation5 + $0x5c0] ss:$8 sps:$4 sm:$0xff]   ;;  %v2575_v4 = vld [vmem:[#allocation5 + $0x4b4] ss:$8 sps:$4 sm:$0xff]  }
  0x9c   :  { %1784 = vmatprep.subr.bf16.mxu1 %v2494_v5  ;;  %v2578_v5 = vld [vmem:[#allocation5 + $0x5b4] ss:$8 sps:$4 sm:$0xff]  }
  0x9e   :  { %1744 = vmatpush2.bf16.msra.mxu0 %v2489_v6  ;;  %v2573_v6 = vld [vmem:[#allocation5 + $0x4b0] ss:$8 sps:$4 sm:$0xff]  }
  0x9f   :  { %1785 = vmatpush2.bf16.msra.mxu1 %v2492_v7  ;;  %1745 = vmatprep.subr.bf16.mxu0 %v2497_v8  ;;  %v2576_v7 = vld [vmem:[#allocation5 + $0x5b0] ss:$8 sps:$4 sm:$0xff]   ;;  %v2581_v8 = vld [vmem:[#allocation5 + $0x4a4] ss:$8 sps:$4 sm:$0xff]  }
  0xa0   :  { %1786 = vmatprep.subr.bf16.mxu1 %v2500_v9  ;;  %v2584_v9 = vld [vmem:[#allocation5 + $0x5a4] ss:$8 sps:$4 sm:$0xff]  }
  0xa2   :  { %1746 = vmatpush2.bf16.msra.mxu0 %v2495_v10  ;;  %v2579_v10 = vld [vmem:[#allocation5 + $0x4a0] ss:$8 sps:$4 sm:$0xff]  }
  0xa3   :  { %1787 = vmatpush2.bf16.msra.mxu1 %v2498_v11  ;;  %1797 = vmatprep.subr.bf16.mxu0 %v2503_v14  ;;  %v2582_v11 = vld [vmem:[#allocation5 + $0x5a0] ss:$8 sps:$4 sm:$0xff]   ;;  %v2585_v14 = vld [vmem:[#allocation5 + $0x490] ss:$8 sps:$4 sm:$0xff]  }
  0xa4   :  { %1838 = vmatprep.subr.bf16.mxu1 %v2506_v15  ;;  %v2588_v15 = vld [vmem:[#allocation5 + $0x590] ss:$8 sps:$4 sm:$0xff]  }
  0xa5   :  { %1748 = vmatmul.mubr.bf16.vlgmr.msra.gmra.mxu0 %v85_v16  ;;  %v2593_v16 = vld [vmem:[#allocation5 + $0x484] ss:$8 sps:$4 sm:$0xff]  }
  0xa6   :  { %1789 = vmatmul.mubr.bf16.vlgmr.msra.gmra.mxu1 %v87_v17  ;;  %1798 = vmatpush1.bf16.msra.mxu0 %v2501_v18  ;;  %v2596_v17 = vld [vmem:[#allocation5 + $0x584] ss:$8 sps:$4 sm:$0xff]   ;;  %v2591_v18 = vld [vmem:[#allocation5 + $0x480] ss:$8 sps:$4 sm:$0xff]  }
  0xa7   :  { %1839 = vmatpush1.bf16.msra.mxu1 %v2504_v19  ;;  %1799 = vmatprep.subr.bf16.mxu0 %v2509_v20  ;;  %v2594_v19 = vld [vmem:[#allocation5 + $0x580] ss:$8 sps:$4 sm:$0xff]  }
  0xa8   :  { %1840 = vmatprep.subr.bf16.mxu1 %v2512_v21  ;;  %1829 = vmatprep.mubr.bf16.mxu0 %v90_v25  ;;  %v73_v20 = vld [vmem:[#allocation3 + $0x40] sm:$0xff]  ;;  %v75_v21 = vld [vmem:[#allocation3 + $0x50] sm:$0xff] }
  0xa9   :  { %1870 = vmatprep.mubr.bf16.mxu1 %v92_v28  ;;  %v91_v25 = vpack.c.bf16 %v75_v21, %v75_v21  ;;  %v2597_v28 = vld [vmem:[#allocation5 + $0x670] ss:$8 sps:$4 sm:$0xff]   ;;  %v2686_v21 = vld [vmem:[#allocation5 + $0x794] ss:$8 sps:$4 sm:$0xff]  }
  0xaa   :  { %1800 = vmatpush1.bf16.msra.mxu0 %v2507_v23  ;;  %v2602_v23 = vld [vmem:[#allocation5 + $0x774] ss:$8 sps:$4 sm:$0xff]  }
  0xab   :  { %1841 = vmatpush1.bf16.msra.mxu1 %v2510_v24  ;;  %1801 = vmatprep.subr.bf16.mxu0 %v2515_v27  ;;  %v89_v24 = vpack.c.bf16 %v73_v20, %v73_v20  ;;  %v80_v27 = vld [vmem:[#allocation3 + $0x78] sm:$0xff] }
  0xac   :  { %1842 = vmatprep.subr.bf16.mxu1 %v2518_v29  ;;  %v2600_v29 = vld [vmem:[#allocation5 + $0x770] ss:$8 sps:$4 sm:$0xff]   ;;  %v2683_v20 = vld [vmem:[#allocation5 + $0x694] ss:$8 sps:$4 sm:$0xff]  }
  0xae   :  { %1802 = vmatpush1.bf16.msra.mxu0 %v2513_v30  ;;  %v2605_v30 = vld [vmem:[#allocation5 + $0x664] ss:$8 sps:$4 sm:$0xff]  }
  0xaf   :  { %1843 = vmatpush1.bf16.msra.mxu1 %v2516_v31  ;;  %1803 = vmatprep.subr.bf16.mxu0 %v2521_v32  ;;  %v2608_v31 = vld [vmem:[#allocation5 + $0x764] ss:$8 sps:$4 sm:$0xff]   ;;  %v94_v32 = vpack.c.bf16 %v78_v26, %v78_v26  ;;  %v2687_v26 = vld [vmem:[#allocation5 + $0x680] ss:$8 sps:$4 sm:$0xff]  }
  0xb0   :  { %1844 = vmatprep.subr.bf16.mxu1 %v2524_v33  ;;  %v96_v33 = vpack.c.bf16 %v80_v27, %v80_v27  ;;  %v2690_v27 = vld [vmem:[#allocation5 + $0x780] ss:$8 sps:$4 sm:$0xff]  }
  0xb2   :  { %1804 = vmatpush1.bf16.msra.mxu0 %v2519_v34  ;;  %v2603_v34 = vld [vmem:[#allocation5 + $0x660] ss:$8 sps:$4 sm:$0xff]  }
  0xb3   :  { %1845 = vmatpush1.bf16.msra.mxu1 %v2522_v35  ;;  %1805 = vmatprep.subr.bf16.mxu0 %v2527_v36  ;;  %v2606_v35 = vld [vmem:[#allocation5 + $0x760] ss:$8 sps:$4 sm:$0xff]   ;;  %v2611_v36 = vld [vmem:[#allocation5 + $0x654] ss:$8 sps:$4 sm:$0xff]  }
  0xb4   :  { %1846 = vmatprep.subr.bf16.mxu1 %v2530_v37  ;;  %v2614_v37 = vld [vmem:[#allocation5 + $0x754] ss:$8 sps:$4 sm:$0xff]  }
  0xb6   :  { %1806 = vmatpush1.bf16.msra.mxu0 %v2525_v38  ;;  %v2609_v38 = vld [vmem:[#allocation5 + $0x650] ss:$8 sps:$4 sm:$0xff]  }
  0xb7   :  { %1847 = vmatpush1.bf16.msra.mxu1 %v2528_v39  ;;  %1807 = vmatprep.subr.bf16.mxu0 %v2533_v40  ;;  %v2612_v39 = vld [vmem:[#allocation5 + $0x750] ss:$8 sps:$4 sm:$0xff]   ;;  %v2617_v40 = vld [vmem:[#allocation5 + $0x644] ss:$8 sps:$4 sm:$0xff]  }
  0xb8   :  { %1848 = vmatprep.subr.bf16.mxu1 %v2536_v41  ;;  %v2620_v41 = vld [vmem:[#allocation5 + $0x744] ss:$8 sps:$4 sm:$0xff]  }
  0xba   :  { %1808 = vmatpush1.bf16.msra.mxu0 %v2531_v42  ;;  %v2615_v42 = vld [vmem:[#allocation5 + $0x640] ss:$8 sps:$4 sm:$0xff]  }
  0xbb   :  { %1849 = vmatpush1.bf16.msra.mxu1 %v2534_v43  ;;  %1809 = vmatprep.subr.bf16.mxu0 %v2539_v44  ;;  %v2618_v43 = vld [vmem:[#allocation5 + $0x740] ss:$8 sps:$4 sm:$0xff]   ;;  %v2623_v44 = vld [vmem:[#allocation5 + $0x634] ss:$8 sps:$4 sm:$0xff]  }
  0xbc   :  { %1850 = vmatprep.subr.bf16.mxu1 %v2542_v45  ;;  %v2626_v45 = vld [vmem:[#allocation5 + $0x734] ss:$8 sps:$4 sm:$0xff]  }
  0xbe   :  { %1810 = vmatpush1.bf16.msra.mxu0 %v2537_v46  ;;  %v2621_v46 = vld [vmem:[#allocation5 + $0x630] ss:$8 sps:$4 sm:$0xff]  }
  0xbf   :  { %1851 = vmatpush1.bf16.msra.mxu1 %v2540_v47  ;;  %1811 = vmatprep.subr.bf16.mxu0 %v2545_v48  ;;  %v2624_v47 = vld [vmem:[#allocation5 + $0x730] ss:$8 sps:$4 sm:$0xff]   ;;  %v2629_v48 = vld [vmem:[#allocation5 + $0x624] ss:$8 sps:$4 sm:$0xff]  }
  0xc0   :  { %1852 = vmatprep.subr.bf16.mxu1 %v2548_v49  ;;  %v2632_v49 = vld [vmem:[#allocation5 + $0x724] ss:$8 sps:$4 sm:$0xff]  }
  0xc2   :  { %1812 = vmatpush1.bf16.msra.mxu0 %v2543_v50  ;;  %v2627_v50 = vld [vmem:[#allocation5 + $0x620] ss:$8 sps:$4 sm:$0xff]  }
  0xc3   :  { %1853 = vmatpush1.bf16.msra.mxu1 %v2546_v51  ;;  %1813 = vmatprep.subr.bf16.mxu0 %v2551_v52  ;;  %v2630_v51 = vld [vmem:[#allocation5 + $0x720] ss:$8 sps:$4 sm:$0xff]   ;;  %v2635_v52 = vld [vmem:[#allocation5 + $0x614] ss:$8 sps:$4 sm:$0xff]  }
  0xc4   :  { %1854 = vmatprep.subr.bf16.mxu1 %v2554_v53  ;;  %v2638_v53 = vld [vmem:[#allocation5 + $0x714] ss:$8 sps:$4 sm:$0xff]  }
  0xc6   :  { %1814 = vmatpush2.bf16.msra.mxu0 %v2549_v54  ;;  %v2633_v54 = vld [vmem:[#allocation5 + $0x610] ss:$8 sps:$4 sm:$0xff]  }
  0xc7   :  { %1855 = vmatpush2.bf16.msra.mxu1 %v2552_v55  ;;  %1815 = vmatprep.subr.bf16.mxu0 %v2557_v56  ;;  %v2636_v55 = vld [vmem:[#allocation5 + $0x710] ss:$8 sps:$4 sm:$0xff]   ;;  %v2641_v56 = vld [vmem:[#allocation5 + $0x604] ss:$8 sps:$4 sm:$0xff]  }
  0xc8   :  { %1856 = vmatprep.subr.bf16.mxu1 %v2560_v57  ;;  %v2644_v57 = vld [vmem:[#allocation5 + $0x704] ss:$8 sps:$4 sm:$0xff]  }
  0xca   :  { %1816 = vmatpush2.bf16.msra.mxu0 %v2555_v58  ;;  %v2639_v58 = vld [vmem:[#allocation5 + $0x600] ss:$8 sps:$4 sm:$0xff]  }
  0xcb   :  { %1857 = vmatpush2.bf16.msra.mxu1 %v2558_v59  ;;  %1817 = vmatprep.subr.bf16.mxu0 %v2563_v60  ;;  %v2642_v59 = vld [vmem:[#allocation5 + $0x700] ss:$8 sps:$4 sm:$0xff]   ;;  %v2647_v60 = vld [vmem:[#allocation5 + $0x6f4] ss:$8 sps:$4 sm:$0xff]  }
  0xcc   :  { %1858 = vmatprep.subr.bf16.mxu1 %v2566_v61  ;;  %v2650_v61 = vld [vmem:[#allocation5 + $0x7f4] ss:$8 sps:$4 sm:$0xff]  }
  0xce   :  { %1818 = vmatpush2.bf16.msra.mxu0 %v2561_v62  ;;  %v2645_v62 = vld [vmem:[#allocation5 + $0x6f0] ss:$8 sps:$4 sm:$0xff]  }
  0xcf   :  { %1859 = vmatpush2.bf16.msra.mxu1 %v2564_v63  ;;  %1819 = vmatprep.subr.bf16.mxu0 %v2569_v0  ;;  %v2648_v63 = vld [vmem:[#allocation5 + $0x7f0] ss:$8 sps:$4 sm:$0xff]   ;;  %v2653_v0 = vld [vmem:[#allocation5 + $0x6e4] ss:$8 sps:$4 sm:$0xff]  }
  0xd0   :  { %1860 = vmatprep.subr.bf16.mxu1 %v2572_v1  ;;  %v2656_v1 = vld [vmem:[#allocation5 + $0x7e4] ss:$8 sps:$4 sm:$0xff]  }
  0xd2   :  { %1820 = vmatpush2.bf16.msra.mxu0 %v2567_v2  ;;  %v2651_v2 = vld [vmem:[#allocation5 + $0x6e0] ss:$8 sps:$4 sm:$0xff]  }
  0xd3   :  { %1861 = vmatpush2.bf16.msra.mxu1 %v2570_v3  ;;  %1821 = vmatprep.subr.bf16.mxu0 %v2575_v4  ;;  %v2654_v3 = vld [vmem:[#allocation5 + $0x7e0] ss:$8 sps:$4 sm:$0xff]   ;;  %v2659_v4 = vld [vmem:[#allocation5 + $0x6d4] ss:$8 sps:$4 sm:$0xff]  }
  0xd4   :  { %1862 = vmatprep.subr.bf16.mxu1 %v2578_v5  ;;  %v2662_v5 = vld [vmem:[#allocation5 + $0x7d4] ss:$8 sps:$4 sm:$0xff]  }
  0xd6   :  { %1822 = vmatpush2.bf16.msra.mxu0 %v2573_v6  ;;  %v2657_v6 = vld [vmem:[#allocation5 + $0x6d0] ss:$8 sps:$4 sm:$0xff]  }
  0xd7   :  { %1863 = vmatpush2.bf16.msra.mxu1 %v2576_v7  ;;  %1823 = vmatprep.subr.bf16.mxu0 %v2581_v8  ;;  %v2660_v7 = vld [vmem:[#allocation5 + $0x7d0] ss:$8 sps:$4 sm:$0xff]   ;;  %v2665_v8 = vld [vmem:[#allocation5 + $0x6c4] ss:$8 sps:$4 sm:$0xff]  }
  0xd8   :  { %1864 = vmatprep.subr.bf16.mxu1 %v2584_v9  ;;  %v2668_v9 = vld [vmem:[#allocation5 + $0x7c4] ss:$8 sps:$4 sm:$0xff]  }
  0xda   :  { %1824 = vmatpush2.bf16.msra.mxu0 %v2579_v10  ;;  %v2663_v10 = vld [vmem:[#allocation5 + $0x6c0] ss:$8 sps:$4 sm:$0xff]  }
  0xdb   :  { %1865 = vmatpush2.bf16.msra.mxu1 %v2582_v11  ;;  %1825 = vmatprep.subr.bf16.mxu0 %v2587_v12  ;;  %v2666_v11 = vld [vmem:[#allocation5 + $0x7c0] ss:$8 sps:$4 sm:$0xff]   ;;  %v2671_v12 = vld [vmem:[#allocation5 + $0x6b4] ss:$8 sps:$4 sm:$0xff]  }
  0xdc   :  { %1866 = vmatprep.subr.bf16.mxu1 %v2590_v13  ;;  %v2674_v13 = vld [vmem:[#allocation5 + $0x7b4] ss:$8 sps:$4 sm:$0xff]  }
  0xde   :  { %1826 = vmatpush2.bf16.msra.mxu0 %v2585_v14  ;;  %v2669_v14 = vld [vmem:[#allocation5 + $0x6b0] ss:$8 sps:$4 sm:$0xff]  }
  0xdf   :  { %1867 = vmatpush2.bf16.msra.mxu1 %v2588_v15  ;;  %1827 = vmatprep.subr.bf16.mxu0 %v2593_v16  ;;  %v2672_v15 = vld [vmem:[#allocation5 + $0x7b0] ss:$8 sps:$4 sm:$0xff]   ;;  %v2677_v16 = vld [vmem:[#allocation5 + $0x6a4] ss:$8 sps:$4 sm:$0xff]  }
  0xe0   :  { %1868 = vmatprep.subr.bf16.mxu1 %v2596_v17  ;;  %v2680_v17 = vld [vmem:[#allocation5 + $0x7a4] ss:$8 sps:$4 sm:$0xff]  }
  0xe2   :  { %1828 = vmatpush2.bf16.msra.mxu0 %v2591_v18  ;;  %v2675_v18 = vld [vmem:[#allocation5 + $0x6a0] ss:$8 sps:$4 sm:$0xff]  }
  0xe3   :  { %1869 = vmatpush2.bf16.msra.mxu1 %v2594_v19  ;;  %1879 = vmatprep.subr.bf16.mxu0 %v2599_v22  ;;  %v2678_v19 = vld [vmem:[#allocation5 + $0x7a0] ss:$8 sps:$4 sm:$0xff]   ;;  %v2681_v22 = vld [vmem:[#allocation5 + $0x690] ss:$8 sps:$4 sm:$0xff]  }
  0xe4   :  { %1920 = vmatprep.subr.bf16.mxu1 %v2602_v23  ;;  %v2684_v23 = vld [vmem:[#allocation5 + $0x790] ss:$8 sps:$4 sm:$0xff]  }
  0xe5   :  { %1830 = vmatmul.mubr.bf16.vlgmr.msra.gmra.mxu0 %v89_v24  ;;  %v2689_v24 = vld [vmem:[#allocation5 + $0x684] ss:$8 sps:$4 sm:$0xff]  }
  0xe6   :  { %1871 = vmatmul.mubr.bf16.vlgmr.msra.gmra.mxu1 %v91_v25  ;;  %1880 = vmatpush1.bf16.msra.mxu0 %v2597_v28  ;;  %v2692_v25 = vld [vmem:[#allocation5 + $0x784] ss:$8 sps:$4 sm:$0xff]  }
  0xe7   :  { %1921 = vmatpush1.bf16.msra.mxu1 %v2600_v29  ;;  %1881 = vmatprep.subr.bf16.mxu0 %v2605_v30  ;;  %v77_v28 = vld [vmem:[#allocation3 + $0x60] sm:$0xff]  ;;  %v79_v29 = vld [vmem:[#allocation3 + $0x70] sm:$0xff] }
  0xe8   :  { %1922 = vmatprep.subr.bf16.mxu1 %v2608_v31  ;;  %1911 = vmatprep.mubr.bf16.mxu0 %v94_v32  ;;  %v93_v30 = vpack.c.bf16 %v77_v28, %v77_v28  ;;  %v95_v31 = vpack.c.bf16 %v79_v29, %v79_v29 }
  0xe9   :  { %1952 = vmatprep.mubr.bf16.mxu1 %v96_v33 }
  0xea   :  { %1882 = vmatpush1.bf16.msra.mxu0 %v2603_v34 }
  0xeb   :  { %1923 = vmatpush1.bf16.msra.mxu1 %v2606_v35  ;;  %1883 = vmatprep.subr.bf16.mxu0 %v2611_v36 }
  0xec   :  { %1924 = vmatprep.subr.bf16.mxu1 %v2614_v37 }
  0xee   :  { %1884 = vmatpush1.bf16.msra.mxu0 %v2609_v38 }
  0xef   :  { %1925 = vmatpush1.bf16.msra.mxu1 %v2612_v39  ;;  %1885 = vmatprep.subr.bf16.mxu0 %v2617_v40 }
  0xf0   :  { %1926 = vmatprep.subr.bf16.mxu1 %v2620_v41 }
  0xf2   :  { %1886 = vmatpush1.bf16.msra.mxu0 %v2615_v42 }
  0xf3   :  { %1927 = vmatpush1.bf16.msra.mxu1 %v2618_v43  ;;  %1887 = vmatprep.subr.bf16.mxu0 %v2623_v44 }
  0xf4   :  { %1928 = vmatprep.subr.bf16.mxu1 %v2626_v45 }
  0xf6   :  { %1888 = vmatpush1.bf16.msra.mxu0 %v2621_v46 }
  0xf7   :  { %1929 = vmatpush1.bf16.msra.mxu1 %v2624_v47  ;;  %1889 = vmatprep.subr.bf16.mxu0 %v2629_v48 }
  0xf8   :  { %1930 = vmatprep.subr.bf16.mxu1 %v2632_v49 }
  0xfa   :  { %1890 = vmatpush1.bf16.msra.mxu0 %v2627_v50 }
  0xfb   :  { %1931 = vmatpush1.bf16.msra.mxu1 %v2630_v51  ;;  %1891 = vmatprep.subr.bf16.mxu0 %v2635_v52 }
  0xfc   :  { %1932 = vmatprep.subr.bf16.mxu1 %v2638_v53 }
  0xfe   :  { %1892 = vmatpush1.bf16.msra.mxu0 %v2633_v54 }
  0xff   :  { %1933 = vmatpush1.bf16.msra.mxu1 %v2636_v55  ;;  %1893 = vmatprep.subr.bf16.mxu0 %v2641_v56 }
 0x100   :  { %1934 = vmatprep.subr.bf16.mxu1 %v2644_v57 }
 0x102   :  { %1894 = vmatpush1.bf16.msra.mxu0 %v2639_v58 }
 0x103   :  { %1935 = vmatpush1.bf16.msra.mxu1 %v2642_v59  ;;  %1895 = vmatprep.subr.bf16.mxu0 %v2647_v60 }
 0x104   :  { %1936 = vmatprep.subr.bf16.mxu1 %v2650_v61 }
 0x106   :  { %1896 = vmatpush2.bf16.msra.mxu0 %v2645_v62 }
 0x107   :  { %1937 = vmatpush2.bf16.msra.mxu1 %v2648_v63  ;;  %1897 = vmatprep.subr.bf16.mxu0 %v2653_v0  ;;  %v1972_v0 = vlaneseq }
 0x108   :  { %1938 = vmatprep.subr.bf16.mxu1 %v2656_v1 }
 0x109   :  { %v1973_v1 = vshrl.u32 %v1972_v0, 7 }
 0x10a   :  { %1898 = vmatpush2.bf16.msra.mxu0 %v2651_v2 }
 0x10b   :  { %1939 = vmatpush2.bf16.msra.mxu1 %v2654_v3  ;;  %1899 = vmatprep.subr.bf16.mxu0 %v2659_v4  ;;  %v1974_v3 = vsub.s32 0, %v1973_v1  ;;  %v1970_v4 = vld [vmem:[#allocation7] sm:$0x3] }
 0x10c   :  { %1940 = vmatprep.subr.bf16.mxu1 %v2662_v5  ;;  %v1978_v5 = vsub.s32 1, %v1973_v1 }
 0x10e   :  { %1900 = vmatpush2.bf16.msra.mxu0 %v2657_v6 }
 0x10f   :  { %1941 = vmatpush2.bf16.msra.mxu1 %v2660_v7  ;;  %1901 = vmatprep.subr.bf16.mxu0 %v2665_v8 }
 0x110   :  { %1942 = vmatprep.subr.bf16.mxu1 %v2668_v9 }
 0x112   :  { %1902 = vmatpush2.bf16.msra.mxu0 %v2663_v10  ;;  %v1975_v10 = vrot.slane %v1970_v4, %v1974_v3 }
 0x113   :  { %1943 = vmatpush2.bf16.msra.mxu1 %v2666_v11  ;;  %1903 = vmatprep.subr.bf16.mxu0 %v2671_v12 }
 0x114   :  { %1944 = vmatprep.subr.bf16.mxu1 %v2674_v13 }
 0x116   :  { %1904 = vmatpush2.bf16.msra.mxu0 %v2669_v14 }
 0x117   :  { %1945 = vmatpush2.bf16.msra.mxu1 %v2672_v15  ;;  %1905 = vmatprep.subr.bf16.mxu0 %v2677_v16  ;;  %v1979_v15 = vrot.slane %v1970_v4, %v1978_v5 }
 0x118   :  { %1946 = vmatprep.subr.bf16.mxu1 %v2680_v17 }
 0x11a   :  { %1906 = vmatpush2.bf16.msra.mxu0 %v2675_v18 }
 0x11b   :  { %1947 = vmatpush2.bf16.msra.mxu1 %v2678_v19  ;;  %1907 = vmatprep.subr.bf16.mxu0 %v2683_v20  ;;  %v1990_v20 = vld [vmem:[%s2816_s3] ss:$2 sm:$0x3] }
 0x11c   :  { %1948 = vmatprep.subr.bf16.mxu1 %v2686_v21  ;;  %v2302_v21 = vld [vmem:[%s2816_s3 + $0x1] ss:$2 sm:$0x3] }
 0x11d   :  { %v2013_v28 = vrot.slane %v2302_v21, %v1974_v3  ;;  %v2017_v29 = vrot.slane %v2302_v21, %v1978_v5 }
 0x11e   :  { %1908 = vmatpush2.bf16.msra.mxu0 %v2681_v22 }
 0x11f   :  { %1949 = vmatpush2.bf16.msra.mxu1 %v2684_v23  ;;  %1909 = vmatprep.subr.bf16.mxu0 %v2689_v24 }
 0x120   :  { %1950 = vmatprep.subr.bf16.mxu1 %v2692_v25 }
 0x122   :  { %1910 = vmatpush2.bf16.msra.mxu0 %v2687_v26  ;;  %v1995_v26 = vrot.slane %v1990_v20, %v1974_v3 }
 0x123   :  { %1951 = vmatpush2.bf16.msra.mxu1 %v2690_v27  ;;  %v1999_v27 = vrot.slane %v1990_v20, %v1978_v5 }
 0x125   :  { %v1667_v32 = vpop.f32.mrf.mxu0  ;;  %1912 = vmatmul.mubr.bf16.vlgmr.msra.gmra.mxu0 %v93_v30 }
 0x126   :  { %v1708_v33 = vpop.f32.mrf.mxu1  ;;  %1953 = vmatmul.mubr.bf16.vlgmr.msra.gmra.mxu1 %v95_v31 }
 0x127   :  { %v1709_v34 = vadd.f32 %v1708_v33, %v1667_v32  ;;  %v1669_v35 = vpop.f32.mrf.mxu0 }
 0x128   :  { %v1710_v36 = vpop.f32.mrf.mxu1 }
 0x129   :  { %v1711_v37 = vadd.f32 %v1710_v36, %v1669_v35  ;;  %v1671_v38 = vpop.f32.mrf.mxu0 }
 0x12a   :  { %v1712_v39 = vpop.f32.mrf.mxu1 }
 0x12b   :  { %v1672_v40 = vpop.f32.mrf.mxu0 }
 0x12c   :  { %v1713_v41 = vpop.f32.mrf.mxu1  ;;  %v2303_v40 = vld [vmem:[%s2817_s4] ss:$0 sm:$0xff] }
 0x165   :  { %v1749_v42 = vpop.f32.mrf.mxu0 }
 0x166   :  { %v1790_v43 = vpop.f32.mrf.mxu1  ;;  %v1750_v44 = vadd.f32 %v1749_v42, %v1709_v34 }
 0x167   :  { %v1751_v45 = vpop.f32.mrf.mxu0 }
 0x168   :  { %v1792_v46 = vpop.f32.mrf.mxu1  ;;  %v1791_v47 = vadd.f32 %v1790_v43, %v1750_v44  ;;  %v1752_v48 = vadd.f32 %v1751_v45, %v1711_v37 }
 0x169   :  { %v1753_v49 = vpop.f32.mrf.mxu0 }
 0x16a   :  { %v1794_v50 = vpop.f32.mrf.mxu1  ;;  %v1793_v51 = vadd.f32 %v1792_v46, %v1752_v48 }
 0x16b   :  { %v1754_v52 = vpop.f32.mrf.mxu0 }
 0x16c   :  { %v1795_v53 = vpop.f32.mrf.mxu1 }
 0x1a5   :  { %v1831_v54 = vpop.f32.mrf.mxu0 }
 0x1a6   :  { %v1872_v55 = vpop.f32.mrf.mxu1  ;;  %v1832_v56 = vadd.f32 %v1831_v54, %v1791_v47 }
 0x1a7   :  { %v1833_v57 = vpop.f32.mrf.mxu0 }
 0x1a8   :  { %v1874_v58 = vpop.f32.mrf.mxu1  ;;  %v1873_v59 = vadd.f32 %v1872_v55, %v1832_v56  ;;  %v1834_v2 = vadd.f32 %v1833_v57, %v1793_v51 }
 0x1a9   :  { %v1835_v60 = vpop.f32.mrf.mxu0 }
 0x1aa   :  { %v1876_v61 = vpop.f32.mrf.mxu1  ;;  %v1875_v8 = vadd.f32 %v1874_v58, %v1834_v2 }
 0x1ab   :  { %v1836_v62 = vpop.f32.mrf.mxu0 }
 0x1ac   :  { %v1877_v63 = vpop.f32.mrf.mxu1 }
 0x1e5   :  { %v1913_v6 = vpop.f32.mrf.mxu0 }
 0x1e6   :  { %v1954_v7 = vpop.f32.mrf.mxu1  ;;  %v1914_v9 = vadd.f32 %v1913_v6, %v1873_v59 }
 0x1e7   :  { %v1915_v11 = vpop.f32.mrf.mxu0 }
 0x1e8   :  { %v1956_v12 = vpop.f32.mrf.mxu1  ;;  %v1955_v13 = vadd.f32 %v1954_v7, %v1914_v9  ;;  %v1916_v14 = vadd.f32 %v1915_v11, %v1875_v8 }
 0x1e9   :  { %v1917_v16 = vpop.f32.mrf.mxu0 }
 0x1ea   :  { %v1958_v17 = vpop.f32.mrf.mxu1  ;;  %v1982_v18 = vadd.f32 %v1975_v10, %v1955_v13  ;;  %v1957_v19 = vadd.f32 %v1956_v12, %v1916_v14 }
 0x1eb   :  { %v1918_v22 = vpop.f32.mrf.mxu0 }
 0x1ec   :  { %v1959_v23 = vpop.f32.mrf.mxu1  ;;  %v1986_v24 = vmul.f32 0.2, %v1982_v18  ;;  %v1983_v25 = vadd.f32 %v1979_v15, %v1957_v19  ;;  %vm1984_vm0 = vcmp.ge.f32.partialorder %v1982_v18, 0.0 }
 0x1ee   :  { %v1987_v30 = vmul.f32 0.2, %v1983_v25  ;;  %vm1985_vm1 = vcmp.ge.f32.partialorder %v1983_v25, 0.0  ;;  %v1988_v31 = vsel %vm1984_vm0, %v1982_v18, %v1986_v24 }
 0x1ef   :  { %v2002_v33 = vmul.f32 %v1995_v26, %v1988_v31  ;;  %v2020_v35 = vmul.f32 %v2013_v28, %v1988_v31 }
 0x1f0   :  { %v1989_v32 = vsel %vm1985_vm1, %v1983_v25, %v1987_v30 }
 0x1f1   :  { %v2003_v34 = vmul.f32 %v1999_v27, %v1989_v32  ;;  %v2021_v36 = vmul.f32 %v2017_v29, %v1989_v32 }
 0x1f3   :  { %v2004_v37 = vadd.f32 %v2003_v34, %v2002_v33  ;;  %v2022_v38 = vadd.f32 %v2021_v36, %v2020_v35 }
 0x1f5   :  { %2005 = vadd.xlane.f32.xlu0 %v2004_v37 }
 0x1f9   :  { %2023 = vadd.xlane.f32.xlu0 %v2022_v38 }
 0x27e   :  { %v2006_v39 = vpop.xlane.xlu0 %2005 }
 0x282   :  { %v2024_v41 = vpop.xlane.xlu0 %2023 }
 0x283   :  { %v2026_v42 = vsel %vm2025_vm2, %v2006_v39, %v2024_v41 }
 0x284   :  { %v2034_v43 = vadd.f32 %v2303_v40, %v2026_v42 }
 0x286   :  { %vm2035_vm4 = vcmp.ge.f32.partialorder %v2034_v43, 0.0  ;;  %v2036_v44 = vmul.f32 0.2, %v2034_v43 }
 0x288   :  { %v2037_v45 = vsel %vm2035_vm4, %v2034_v43, %v2036_v44 }
 0x289   :  { %2039 = vst.msk [vmem:[%s2818_s5] sm:$0xff] %vm2038_vm3, %v2037_v45 }
 0x28a   :  { %2044 = vsyncpa [#allocation4], 1 }
 0x28b   :  { %2045 = vsyncpa [#allocation6], 1 }

</bundles_post_ra>
